<compile_context>
chip_gen: v5e
topology: v5e:2x2
jax: 0.10.0
libtpu: 0.0.40
codegen_flags: <defaults>
</compile_context>

<pallas_src>
import functools

import jax
import jax.numpy as jnp
from jax import lax
from jax.experimental import pallas as pl
from jax.experimental.pallas import tpu as pltpu


def _round_up(x, m):
    return ((x + m - 1) // m) * m


def _self_attn_kernel(x_ref, w_ref, b_ref, gamma_ref, o_ref, qkv_ref, *, kpad, tq):
    """One (batch, query-tile) grid step.

    x_ref    : (1, C, N)   f32   channel-major feature map (lanes = N)
    w_ref    : (Ctot, C)   bf16  fused [Wq_pad; Wk_pad; Wv]
    b_ref    : (Ctot, 1)   f32   fused bias (padded rows are zero)
    gamma_ref: (1,)        f32   SMEM scalar
    o_ref    : (1, C, TQ)  f32   output query tile (TQ lane-dense)
    qkv_ref  : (Ctot, N)   bf16  scratch: QKV cached across the query-tile loop
    """
    qt = pl.program_id(1)

    # Fused QKV projection, computed once per batch (qt == 0) and cached.
    @pl.when(qt == 0)
    def _():
        x_bf = x_ref[0].astype(jnp.bfloat16)                               # (C, N)
        qkv = jnp.dot(w_ref[...], x_bf,
                      preferred_element_type=jnp.float32)                  # (Ctot, N)
        qkv = qkv + b_ref[...]                                             # bias bcast
        qkv_ref[...] = qkv.astype(jnp.bfloat16)

    c = qkv_ref.shape[0] - 2 * kpad
    qstart = pl.multiple_of(qt * tq, tq)

    q = qkv_ref[pl.ds(0, kpad), pl.ds(qstart, tq)]                         # (KPAD, TQ)
    k = qkv_ref[pl.ds(kpad, kpad), :]                                      # (KPAD, N)
    v = qkv_ref[pl.ds(2 * kpad, c), :]                                     # (C, N)

    # energy[i, j] = sum_c q[c, i] * k[c, j]   (no explicit transpose)
    energy = lax.dot_general(q, k, (((0,), (0,)), ((), ())),
                             preferred_element_type=jnp.float32)           # (TQ, N)

    # Row-wise softmax in f32 (matches nn.Softmax(dim=-1)); padded channels of
    # q/k are exactly zero so they do not affect the energies.
    m = jnp.max(energy, axis=-1, keepdims=True)
    p = jnp.exp(energy - m)
    attn = p * pl.reciprocal(jnp.sum(p, axis=-1, keepdims=True), approx=True)

    # out[c, i] = sum_j v[c, j] * attn[i, j]   (== V @ attention^T)
    out = lax.dot_general(v, attn.astype(jnp.bfloat16),
                          (((1,), (1,)), ((), ())),
                          preferred_element_type=jnp.float32)              # (C, TQ)

    x_tile = x_ref[0, :, pl.ds(qstart, tq)]                                # (C, TQ) f32
    o_ref[0] = gamma_ref[0] * out + x_tile


def _pick_query_tile(n):
    """Largest lane-dense tile dividing N, capped so TQ*N f32 energy <= ~8 MiB."""
    for cand in (512, 256, 128):
        if n % cand == 0 and cand * n * 4 <= 8 * 1024 * 1024:
            return cand
    if n % 128 == 0:
        return 128
    return n


def self_attention_block(x, wq, bq, wk, bk, wv, bv, gamma, *, tq=None):
    """x: (B, C, W, H) NCHW float32. Returns (B, C, W, H)."""
    B, C, W, H = x.shape
    N = W * H
    C8 = wq.shape[0]

    # NCHW -> (B, C, N): a pure reshape (no transpose, no extra HBM pass).
    x_cn = x.reshape(B, C, N).astype(jnp.float32)

    # Fused + padded projection weights.  Q/K sections are zero-padded to a
    # 16-row (bf16 sublane-tile) boundary so in-kernel sublane slices stay
    # tile-aligned; padded channels contribute exactly zero to the energies.
    kpad = _round_up(max(C8, 1), 16)
    pq = kpad - C8
    wq_p = jnp.pad(wq, ((0, pq), (0, 0)))
    wk_p = jnp.pad(wk, ((0, pq), (0, 0)))
    bq_p = jnp.pad(bq, ((0, pq),))
    bk_p = jnp.pad(bk, ((0, pq),))
    w_all = jnp.concatenate([wq_p, wk_p, wv], axis=0).astype(jnp.bfloat16)  # (Ctot, C)
    b_all = jnp.concatenate([bq_p, bk_p, bv], axis=0).reshape(-1, 1)
    b_all = b_all.astype(jnp.float32)                                       # (Ctot, 1)
    ctot = w_all.shape[0]

    # Query-tile size: multiple of 128 when possible (lane-dense stores),
    # otherwise a single full-N tile.
    if tq is None:
        tq = _pick_query_tile(N)
    assert N % tq == 0, "query tile must divide N = W*H"
    nq = N // tq

    gamma1 = gamma.reshape(1).astype(jnp.float32)

    kernel = functools.partial(_self_attn_kernel, kpad=kpad, tq=tq)

    cost = pl.CostEstimate(
        flops=int(B * (2 * ctot * C * N + 2 * kpad * N * N + 2 * C * N * N + 2 * C * N)),
        transcendentals=int(B * N * N),
        bytes_accessed=int(2 * B * C * N * 4 + ctot * C * 2 + ctot * 4 + 4),
    )

    out_cn = pl.pallas_call(
        kernel,
        out_shape=jax.ShapeDtypeStruct((B, C, N), jnp.float32),
        grid_spec=pltpu.PrefetchScalarGridSpec(
            num_scalar_prefetch=0,
            grid=(B, nq),
            in_specs=[
                # x block index is constant over qt -> fetched once per batch.
                pl.BlockSpec((1, C, N), lambda b, q: (b, 0, 0)),
                pl.BlockSpec((ctot, C), lambda b, q: (0, 0)),        # fused W (bf16)
                pl.BlockSpec((ctot, 1), lambda b, q: (0, 0)),        # fused bias
                pl.BlockSpec(memory_space=pltpu.MemorySpace.SMEM),   # gamma scalar
            ],
            out_specs=pl.BlockSpec((1, C, tq), lambda b, q: (b, 0, q)),
            scratch_shapes=[pltpu.VMEM((ctot, N), jnp.bfloat16)],
        ),
        compiler_params=pltpu.CompilerParams(
            # Batch axis parallel (megacore), query-tile axis arbitrary so the
            # cached QKV scratch carries correctly across tiles of one batch.
            dimension_semantics=("parallel", "arbitrary"),
            vmem_limit_bytes=64 * 1024 * 1024,
        ),
        cost_estimate=cost,
    )(x_cn, w_all, b_all, gamma1)

    # (B, C, N) -> NCHW: again a pure reshape.
    return out_cn.reshape(B, C, W, H)


def self_attention_block_ref(x, wq, bq, wk, bk, wv, bv, gamma):
    """Pure-JAX f32 reference matching the PyTorch forward exactly."""
    B, C, W, H = x.shape
    N = W * H
    xf = x.reshape(B, C, N)
    q = jnp.einsum('oc,bcn->bon', wq, xf) + bq[None, :, None]      # (B, C8, N)
    k = jnp.einsum('oc,bcn->bon', wk, xf) + bk[None, :, None]      # (B, C8, N)
    v = jnp.einsum('oc,bcn->bon', wv, xf) + bv[None, :, None]      # (B, C, N)
    energy = jnp.einsum('bcn,bcm->bnm', q, k)                      # (B, N, N)
    attn = jax.nn.softmax(energy, axis=-1)
    out = jnp.einsum('bcm,bnm->bcn', v, attn)                      # (B, C, N)
    out = out.reshape(B, C, W, H)
    return gamma * out + x


if __name__ == "__main__":
    B, C, W, H = 2, 32, 16, 16      # in_dim = 32 -> C//8 = 4, N = 256
    C8 = C // 8

    key = jax.random.PRNGKey(0)
    kx, kq, kbq, kk, kbk, kv, kbv = jax.random.split(key, 7)

    x = jax.random.normal(kx, (B, C, W, H), dtype=jnp.float32)

    # Deterministic synthetic parameters (1x1 conv weights are (C_out, C_in)).
    wq = 0.1 * jax.random.normal(kq, (C8, C), dtype=jnp.float32)
    bq = 0.1 * jax.random.normal(kbq, (C8,), dtype=jnp.float32)
    wk = 0.1 * jax.random.normal(kk, (C8, C), dtype=jnp.float32)
    bk = 0.1 * jax.random.normal(kbk, (C8,), dtype=jnp.float32)
    wv = 0.1 * jax.random.normal(kv, (C, C), dtype=jnp.float32)
    bv = 0.1 * jax.random.normal(kbv, (C,), dtype=jnp.float32)

    # Module initializes gamma to zero (nn.Parameter(torch.zeros(1))):
    # output must equal x (residual path is exact f32).
    gamma0 = jnp.zeros((1,), dtype=jnp.float32)
    out0 = jax.block_until_ready(
        self_attention_block(x, wq, bq, wk, bk, wv, bv, gamma0, tq=128))
    ref0 = self_attention_block_ref(x, wq, bq, wk, bk, wv, bv, gamma0)
    assert out0.shape == (B, C, W, H)
    assert jnp.allclose(out0, ref0, rtol=1e-6, atol=1e-6), "mismatch (gamma=0)"

    # Nonzero gamma: exercises the attention path.  bf16 MXU operands + approx
    # reciprocal => loosened tolerance vs the f32 reference.
    gamma_nz = jnp.array([0.5], dtype=jnp.float32)
    ref_nz = self_attention_block_ref(x, wq, bq, wk, bk, wv, bv, gamma_nz)

    # Default query tile (largest lane-dense divisor of N).
    out_nz = jax.block_until_ready(
        self_attention_block(x, wq, bq, wk, bk, wv, bv, gamma_nz))
    assert jnp.allclose(out_nz, ref_nz, rtol=2e-2, atol=2e-2), "mismatch (default tq)"

    # Two query tiles (exercises the qt loop + cached QKV scratch).
    out_nz2 = jax.block_until_ready(
        self_attention_block(x, wq, bq, wk, bk, wv, bv, gamma_nz, tq=128))
    assert jnp.allclose(out_nz2, ref_nz, rtol=2e-2, atol=2e-2), "mismatch (tq=128)"

    print("KERNEL_OK")
</pallas_src>

<mosaic_0001>
module attributes {stable_mosaic.version = 11 : i64} {
  func.func @_self_attn_kernel(%arg0: i32, %arg1: i32, %arg2: memref<1x32x256xf32, #tpu.memory_space<vmem>>, %arg3: memref<64x32xbf16, #tpu.memory_space<vmem>>, %arg4: memref<64x1xf32, #tpu.memory_space<vmem>>, %arg5: memref<1xf32, #tpu.memory_space<smem>>, %arg6: memref<1x32x128xf32, #tpu.memory_space<vmem>>, %arg7: memref<64x256xbf16, #tpu.memory_space<vmem>>) attributes {dimension_semantics = [#tpu.dimension_semantics<parallel>, #tpu.dimension_semantics<arbitrary>], iteration_bounds = array<i64: 2, 2>, scalar_prefetch = 0 : i64, scratch_operands = 1 : i64, tpu.core_type = #tpu.core_type<tc>, window_params = [{transform_indices = @transform_0, window_bounds = array<i64: 1, 32, 256>}, {pipeline_mode = #tpu.pipeline_mode<synchronous>, transform_indices = @transform_1, window_bounds = array<i64: 64, 32>}, {pipeline_mode = #tpu.pipeline_mode<synchronous>, transform_indices = @transform_2, window_bounds = array<i64: 64, 1>}, {transform_indices = @transform_3, window_bounds = array<i64: 1>}, {transform_indices = @transform_4, window_bounds = array<i64: 1, 32, 128>}]} {
    %c0_i32 = arith.constant 0 : i32
    %0 = arith.cmpi eq, %arg1, %c0_i32 : i32
    %1 = arith.extui %0 : i1 to i32
    %c0_i32_0 = arith.constant 0 : i32
    %2 = arith.cmpi ne, %1, %c0_i32_0 : i32
    scf.if %2 {
      %c0_12 = arith.constant 0 : index
      %c0_13 = arith.constant 0 : index
      %c0_14 = arith.constant 0 : index
      %32 = vector.load %arg2[%c0_12, %c0_13, %c0_14] : memref<1x32x256xf32, #tpu.memory_space<vmem>>, vector<1x32x256xf32>
      %33 = vector.shape_cast %32 : vector<1x32x256xf32> to vector<32x256xf32>
      %34 = arith.truncf %33 : vector<32x256xf32> to vector<32x256xbf16>
      %c0_15 = arith.constant 0 : index
      %c0_16 = arith.constant 0 : index
      %35 = vector.load %arg3[%c0_15, %c0_16] : memref<64x32xbf16, #tpu.memory_space<vmem>>, vector<64x32xbf16>
      %cst_17 = arith.constant dense<0.000000e+00> : vector<64x256xf32>
      %36 = tpu.matmul %35, %34, %cst_17 {dimension_numbers = #tpu.dot_dimension_numbers<[1], [0], [0], [1], [0, 0, 1, 1], [], []>} : vector<64x32xbf16>, vector<32x256xbf16>, vector<64x256xf32> -> vector<64x256xf32>
      %c0_18 = arith.constant 0 : index
      %c0_19 = arith.constant 0 : index
      %37 = vector.load %arg4[%c0_18, %c0_19] : memref<64x1xf32, #tpu.memory_space<vmem>>, vector<64x1xf32>
      %38 = vector.broadcast %37 : vector<64x1xf32> to vector<64x256xf32>
      %39 = arith.addf %36, %38 : vector<64x256xf32>
      %40 = arith.truncf %39 : vector<64x256xf32> to vector<64x256xbf16>
      %c0_20 = arith.constant 0 : index
      %c0_21 = arith.constant 0 : index
      %41 = vector.load %arg7[%c0_20, %c0_21] : memref<64x256xbf16, #tpu.memory_space<vmem>>, vector<64x256xbf16>
      tpu.vector_store %arg7[%c0_20, %c0_21], %40 {strides = array<i32>} : memref<64x256xbf16, #tpu.memory_space<vmem>>, vector<64x256xbf16>,
    } else {
    }
    %c128_i32 = arith.constant 128 : i32
    %3 = arith.muli %arg1, %c128_i32 : i32
    %4 = tpu.assume_multiple %3, 128 : i32
    %c0 = arith.constant 0 : index
    %5 = arith.index_cast %4 : i32 to index
    %6 = vector.load %arg7[%c0, %5] : memref<64x256xbf16, #tpu.memory_space<vmem>>, vector<16x128xbf16>
    %c16 = arith.constant 16 : index
    %c0_1 = arith.constant 0 : index
    %7 = vector.load %arg7[%c16, %c0_1] : memref<64x256xbf16, #tpu.memory_space<vmem>>, vector<16x256xbf16>
    %c32 = arith.constant 32 : index
    %c0_2 = arith.constant 0 : index
    %8 = vector.load %arg7[%c32, %c0_2] : memref<64x256xbf16, #tpu.memory_space<vmem>>, vector<32x256xbf16>
    %cst = arith.constant dense<0.000000e+00> : vector<128x256xf32>
    %9 = tpu.matmul %6, %7, %cst {dimension_numbers = #tpu.dot_dimension_numbers<[0], [0], [1], [1], [0, 1, 1, 1], [], []>} : vector<16x128xbf16>, vector<16x256xbf16>, vector<128x256xf32> -> vector<128x256xf32>
    %cst_3 = arith.constant dense<0xFF800000> : vector<128xf32>
    %10 = vector.multi_reduction <maximumf>, %9, %cst_3 [1] : vector<128x256xf32> to vector<128xf32>
    %11 = vector.shape_cast %10 : vector<128xf32> to vector<128x1xf32>
    %12 = vector.broadcast %11 : vector<128x1xf32> to vector<128x256xf32>
    %13 = arith.subf %9, %12 : vector<128x256xf32>
    %14 = math.exp %13 : vector<128x256xf32>
    %cst_4 = arith.constant dense<0.000000e+00> : vector<128xf32>
    %15 = vector.multi_reduction <add>, %14, %cst_4 [1] : vector<128x256xf32> to vector<128xf32>
    %16 = vector.shape_cast %15 : vector<128xf32> to vector<128x1xf32>
    %17 = tpu.reciprocal %16 {approx = true} : vector<128x1xf32> -> vector<128x1xf32>
    %18 = vector.broadcast %17 : vector<128x1xf32> to vector<128x256xf32>
    %19 = arith.mulf %14, %18 : vector<128x256xf32>
    %20 = arith.truncf %19 : vector<128x256xf32> to vector<128x256xbf16>
    %cst_5 = arith.constant dense<0.000000e+00> : vector<32x128xf32>
    %21 = tpu.matmul %8, %20, %cst_5 {dimension_numbers = #tpu.dot_dimension_numbers<[1], [1], [0], [0], [0, 0, 1, 0], [], []>} : vector<32x256xbf16>, vector<128x256xbf16>, vector<32x128xf32> -> vector<32x128xf32>
    %c0_6 = arith.constant 0 : index
    %c0_7 = arith.constant 0 : index
    %22 = arith.index_cast %4 : i32 to index
    %23 = vector.load %arg2[%c0_6, %c0_7, %22] : memref<1x32x256xf32, #tpu.memory_space<vmem>>, vector<1x32x128xf32>
    %24 = vector.shape_cast %23 : vector<1x32x128xf32> to vector<32x128xf32>
    %c0_8 = arith.constant 0 : index
    %25 = memref.load %arg5[%c0_8] : memref<1xf32, #tpu.memory_space<smem>>
    %26 = vector.broadcast %25 : f32 to vector<32x128xf32>
    %27 = arith.mulf %26, %21 : vector<32x128xf32>
    %28 = arith.addf %27, %24 : vector<32x128xf32>
    %c0_9 = arith.constant 0 : index
    %c0_10 = arith.constant 0 : index
    %c0_11 = arith.constant 0 : index
    %29 = vector.load %arg6[%c0_9, %c0_10, %c0_11] : memref<1x32x128xf32, #tpu.memory_space<vmem>>, vector<1x32x128xf32>
    %30 = vector.shape_cast %29 : vector<1x32x128xf32> to vector<32x128xf32>
    %31 = vector.shape_cast %28 : vector<32x128xf32> to vector<1x32x128xf32>
    tpu.vector_store %arg6[%c0_9, %c0_10, %c0_11], %31 {strides = array<i32>} : memref<1x32x128xf32, #tpu.memory_space<vmem>>, vector<1x32x128xf32>,
    return
  }
  func.func @transform_0(%arg0: i32, %arg1: i32) -> (i32, i32, i32) {
    %c0_i32 = arith.constant 0 : i32
    %c0_i32_0 = arith.constant 0 : i32
    %c0_i32_1 = arith.constant 0 : i32
    return %arg0, %c0_i32, %c0_i32_0 : i32, i32, i32
  }
  func.func @transform_1(%arg0: i32, %arg1: i32) -> (i32, i32) {
    %c0_i32 = arith.constant 0 : i32
    %c0_i32_0 = arith.constant 0 : i32
    %c0_i32_1 = arith.constant 0 : i32
    return %c0_i32, %c0_i32_0 : i32, i32
  }
  func.func @transform_2(%arg0: i32, %arg1: i32) -> (i32, i32) {
    %c0_i32 = arith.constant 0 : i32
    %c0_i32_0 = arith.constant 0 : i32
    %c0_i32_1 = arith.constant 0 : i32
    return %c0_i32, %c0_i32_0 : i32, i32
  }
  func.func @transform_3(%arg0: i32, %arg1: i32) -> i32 {
    %c0_i32 = arith.constant 0 : i32
    %c0_i32_0 = arith.constant 0 : i32
    return %c0_i32 : i32
  }
  func.func @transform_4(%arg0: i32, %arg1: i32) -> (i32, i32, i32) {
    %c0_i32 = arith.constant 0 : i32
    %c0_i32_0 = arith.constant 0 : i32
    return %arg0, %c0_i32, %arg1 : i32, i32, i32
  }
}

</mosaic_0001>

<bundles_post_ra>
// kernel: tpu_custom_call.1
= control target key start
LH: loop header
LB: loop body
LE: loop exit
PB: predicated region body
PF: predicated region fallthrough
CT: control target
= control target key end

     0   :  { %s2013_s0 = inlined_call_operand.hbm [shape: f32[2,32,256], index: 0, kind: input, shape index: {}]   ;;  %s2014_s1 = inlined_call_operand.vmem [shape: bf16[64,32], index: 1, kind: input, shape index: {}]   ;;  %s2015_s2 = inlined_call_operand.vmem [shape: f32[64,1], index: 2, kind: input, shape index: {}]   ;;  %s2016_s3 = inlined_call_operand.<no memory space> [shape: f32[1], index: 3, kind: input, shape index: {}]   ;;  %s2017_s4 = inlined_call_operand.hbm [shape: f32[2,32,256], index: 4, kind: output, shape index: {}]  }
   0x1   :  { %9 = sst [smem:[#allocation3]] %s2016_s3 }
   0x2   :  { %10 = vsyncpa [#allocation5], 0 }
   0x3   :  { %12 = vsyncpa [#allocation5 + $0x1], 0 }
   0x4   :  { %13 = vsyncpa [#allocation6], 0 }
   0x5   :  { %15 = vsyncpa [#allocation6 + $0x1], 0  ;;  %s1521_s17 = smov 0   ;;  %s1523_s18 = smov 0  }
   0x6   :  { %s1525_s19 = smov 0   ;;  %s1527_s20 = smov 0  }
   0x7   :  { %s1529_s21 = smov 0   ;;  %s1531_s22 = smov 0  }
   0x8   :  { %s1533_s23 = smov 0   ;;  %s1535_s24 = smov 0  }
   0x9   :  { %s1537_s3 = smov 0   ;;  %s1539_s25 = smov 0  }
   0xa   :  { %s1541_s26 = smov 0  }
   0xb LB: > { %2022 = sst [smem:[#allocation10_spill]] %s1477_s3  ;;  %s1022_s27 = sadd.s32 4294967295, %s1485_s26   ;;  %s1485_s26 = sphi %s1541_s26, %s21_s26   ;;  %s1481_s25 = sphi %s1539_s25, %s2033_s25   ;;  %s1477_s3 = sphi %s1537_s3, %s2032_s3   ;;  %s1473_s24 = sphi %s1535_s24, %s2031_s24   ;;  %s1469_s23 = sphi %s1533_s23, %s2030_s23   ;;  %s1465_s22 = sphi %s1531_s22, %s2039_s22   ;;  %s1461_s21 = sphi %s1529_s21, %s2038_s21   ;;  %s1457_s20 = sphi %s1527_s20, %s2037_s20   ;;  %s1453_s19 = sphi %s1525_s19, %s2036_s19   ;;  %s1449_s18 = sphi %s1523_s18, %s2035_s18   ;;  %s1445_s17 = sphi %s1521_s17, %s2034_s17  }
   0xc   : > { %2023 = sst [smem:[#allocation11_spill]] %s1481_s25  ;;  %s1023_s28 = sadd.s32 4294967294, %s1485_s26  }
   0xd   : > { %s30_s29 = sadd.s32 1, %s1477_s3  ;;  %s33_s30 = sadd.s32 1, %s1481_s25 }
   0xe   : > { %p31_p0 = scmp.ge.s32.totalorder %s30_s29, 2  ;;  %s40_s5 = sadd.s32 1, %s1465_s22 }
   0xf   : > { %p47_p1 = scmp.ne.s32.totalorder %s1465_s22, %s1461_s21  ;;  %p48_p2 = scmp.eq.s32.totalorder %s1485_s26, 0 }
  0x10   : > { %s2041_s29 = smov (%p31_p0, %s30_s29), 0  ;;  %s2043_s30 = smov (!%p31_p0, %s33_s30), %s1481_s25 }
  0x11   : > { %2024 = sst [smem:[#allocation12_spill]] %s2041_s29  ;;  %p1585_p3 = por %p48_p2, %p47_p1 }
  0x12   : > { %p53_p4 = scmp.ne.s32.totalorder %s1461_s21, %s1457_s20  ;;  %p35_p5 = scmp.ge.s32.totalorder %s2043_s30, 2 }
  0x13   : > { %p54_p6 = scmp.eq.s32.totalorder %s1022_s27, 0  ;;  %s127_s7 = ssub.s32 %s1477_s3, %s2041_s29 }
  0x14   : > { %s131_s8 = sadd.s32 1, %s1453_s19  ;;  %s2045_s30 = smov (%p35_p5, %s2043_s30), 0 }
  0x15   : > { %2026 = sst [smem:[#allocation13_spill]] %s2045_s30  ;;  %p1595_p7 = por %p54_p6, %p53_p4 }
  0x16   : > { %p141_p8 = scmp.ne.s32.totalorder %s1453_s19, %s1449_s18  ;;  %s37_s10 = ssub.s32 %s1481_s25, %s2045_s30 }
  0x17   : > { %p142_p9 = scmp.eq.s32.totalorder %s1022_s27, 3  ;;  %p38_p10 = scmp.eq.s32.totalorder %s37_s10, 0 }
  0x18   : > { %s128_s11 = sor.u32 %s127_s7, %s37_s10  ;;  %p147_p13 = scmp.ne.s32.totalorder %s1449_s18, %s1445_s17 }
  0x19   : > { %p129_p11 = scmp.eq.s32.totalorder %s128_s11, 0  ;;  %p1603_p12 = por %p142_p9, %p141_p8 }
  0x1a   : > { %s1608_s13 = scalar_select %p38_p10, %s1465_s22, %s40_s5  }
  0x1b   : > { %s1611_s14 = scalar_select %p129_p11, %s1453_s19, %s131_s8  }
  0x1c   : > { %p148_p0 = scmp.eq.s32.totalorder %s1023_s28, 3  ;;  %p1137_p1 = scmp.lt.s32.totalorder %s1485_s26, 4 }
  0x1d   : > { %s177_s16 = sand.u32 1, %s1465_s22   ;;  %s1109_s27 = sshll.u32 %s1481_s25, 6 }
  0x1e   : > { %p1616_p2 = por %p148_p0, %p147_p13  ;;  %s1026_s20 = sshll.u32 %s177_s16, 6 }
  0x1f   : > { %s186_s11 = scalar_lea.hbm %s2013_s0, %s1109_s27  ;;  %s181_s5 = scalar_lea.vmem [#allocation4], %s1026_s20 }
  0x20   : > { %s189_s30 = sshll.u32 %s181_s5, 4  ;;  %s187_s29 = sshll.u32 %s186_s11, 4  ;;  %s190_s30 = int_to_ptr.vmem [resolvable:$true] %s189_s30  ;;  %s188_s29 = int_to_ptr.hbm [resolvable:$true] %s187_s29 }
  0x21   : > { %p1130_p4 = pnand %p1137_p1, %p1585_p3  ;;  %p1029_p5 = scmp.ge.s32.totalorder %s1485_s26, 1 }
  0x22   : > { %s178_s28 = scalar_lea.sflag [#allocation5], %s177_s16  ;;  %s1487_s8 = smov 256  }
  0x23   : > { %s1488_s3 = smov 16   ;;  %p197_p6 = scmp.lt.s32.totalorder %s1485_s26, 5 }
  0x24   : > { %1132 = dma.hbm_to_vmem [thread:$0]  (!%p1130_p4), %s188_s29, 1024, %s190_s30, %s178_s28, %s1487_s8, %s1487_s8, %s1488_s3  }
  0x25   : > { %p198_p8 = pnand %p1029_p5, %p197_p6 }
  0x26   : > { %s203_s25 = sand.u32 (!%p198_p8), 1, %s1461_s21  }
  0x27   : > { %201 = sbr.rel (%p198_p8) target bundleno = 1141 (0x475), region = 36  ;;  %s1030_s7 = sshll.u32 (!%p198_p8), %s203_s25, 6 }
  0x28   : > { %s204_s27 = scalar_lea.sflag (!%p198_p8), [#allocation5], %s203_s25  ;;  %s1630_s20 = scalar_lea.vmem (!%p198_p8), [#allocation4], %s1030_s7 }
  0x2c   : > { %1436 = dma.done.wait (%p1595_p7), %s204_s27, 1024  }
  0x2d   : > { %1438 = vsyncadd (%p1595_p7), %s204_s27, 4294966272  ;;  %s230_s6 = sand.u32 1, %s1449_s18   ;;  %p1032_p3 = scmp.ne.s32.totalorder %s1469_s23, 0 }
  0x2e   : > { %s1031_s3 = sshll.u32 %s230_s6, 5 }
  0x2f   : > { %s1639_s29 = scalar_lea.vmem [#allocation7], %s1031_s3  ;;  %237 = sbr.rel (%p1032_p3) target bundleno = 224 (0xe0), region = 44 }
  0x34   : > { %v242_v0 = vld [vmem:[%s1630_s20 + $0x20] sm:$0xff]  ;;  %v244_v1 = vld [vmem:[%s1630_s20 + $0x30] sm:$0xff]  ;;  %v243_v2 = vld [vmem:[%s1630_s20 + $0x28] sm:$0xff]  ;;  %v1489_v7 = vmov 0   ;;  %vm326_vm0 = vcmask 261120  }
  0x35   : > { %v248_v3 = vpack.c.bf16 %v244_v1, %v242_v0  ;;  %v245_v4 = vld [vmem:[%s1630_s20 + $0x38] sm:$0xff]  ;;  %v238_v5 = vld [vmem:[%s1630_s20] sm:$0xff]  ;;  %v240_v6 = vld [vmem:[%s1630_s20 + $0x10] sm:$0xff]  ;;  %1235 = vset.pattern.permute.xlu1 %v1489_v7  ;;  %1234 = vset.pattern.permute.xlu0 %v1489_v7 }
  0x36   : > { %v249_v8 = vpack.c.bf16 %v245_v4, %v243_v2  ;;  %v239_v9 = vld [vmem:[%s1630_s20 + $0x8] sm:$0xff]  ;;  %v241_v10 = vld [vmem:[%s1630_s20 + $0x18] sm:$0xff]  ;;  %1236 = vset.pattern.permute.xlu2 %v1489_v7  ;;  %v246_v11 = vpack.c.bf16 %v240_v6, %v238_v5  ;;  %v260_v12 = vld [vmem:[%s2015_s2 + $0x10] sm:$0xff] }
  0x37   : > { %345 = vmatpush.bf16.msra.mxu0 %v248_v3  ;;  %1121 = vmatpush.bf16.msra.mxu2 %v248_v3  ;;  %v258_v13 = vld [vmem:[%s2015_s2] sm:$0xff]  ;;  %v247_v14 = vpack.c.bf16 %v241_v10, %v239_v9  ;;  %v1112_v16 = vld [vmem:[%s2014_s1 + $0x10] sm:$0xff]  ;;  %v261_v18 = vld [vmem:[%s2015_s2 + $0x18] sm:$0xff] }
  0x38   : > { %374 = vmatpush.bf16.msra.mxu1 %v249_v8  ;;  %1123 = vmatpush.bf16.msra.mxu3 %v249_v8  ;;  %v1110_v15 = vld [vmem:[%s2014_s1] sm:$0xff]  ;;  %v259_v19 = vld [vmem:[%s2015_s2 + $0x8] sm:$0xff]  ;;  %v265_v21 = vld [vmem:[%s2015_s2 + $0x38] sm:$0xff] }
  0x39   : > { %278 = vperm.xlu1 %1235, %v260_v12   ;;  %268 = vperm.xlu0 %1234, %v258_v13   ;;  %v262_v17 = vld [vmem:[%s2015_s2 + $0x20] sm:$0xff]  ;;  %v263_v20 = vld [vmem:[%s2015_s2 + $0x28] sm:$0xff]  ;;  %v264_v22 = vld [vmem:[%s2015_s2 + $0x30] sm:$0xff] }
  0x3a   : > { %288 = vperm.xlu2 %1236, %v262_v17   ;;  %v1111_v23 = vld [vmem:[%s2014_s1 + $0x8] sm:$0xff]  ;;  %v1113_v24 = vld [vmem:[%s2014_s1 + $0x18] sm:$0xff] }
  0x3b   : > { %346 = vmatpush.bf16.msra.mxu0 %v246_v11  ;;  %1122 = vmatpush.bf16.msra.mxu2 %v246_v11 }
  0x3c   : > { %375 = vmatpush.bf16.msra.mxu1 %v247_v14  ;;  %1124 = vmatpush.bf16.msra.mxu3 %v247_v14 }
  0x3e   : > { %1049 = vmatmul.msk.bf16.vlgmr.msra.gmra.mxu0 %vm326_vm0, %v1110_v15  ;;  %1051 = vmatmul.msk.bf16.vlgmr.msra.gmra.mxu2 %vm326_vm0, %v1112_v16 }
  0x3f   : > { %1053 = vmatmul.msk.bf16.vlgmr.msra.gmra.mxu1 %vm326_vm0, %v1110_v15  ;;  %1055 = vmatmul.msk.bf16.vlgmr.msra.gmra.mxu3 %vm326_vm0, %v1112_v16 }
  0x41   : > { %283 = vperm.xlu1 %1235, %v261_v18   ;;  %273 = vperm.xlu0 %1234, %v259_v19  }
  0x42   : > { %293 = vperm.xlu2 %1236, %v263_v20  }
  0x49   : > { %303 = vperm.xlu1 %1235, %v265_v21   ;;  %298 = vperm.xlu0 %1234, %v264_v22  }
  0x4e   : > { %1050 = vmatmul.msk.bf16.gmra.mxu0 %vm326_vm0, %v1111_v23  ;;  %1052 = vmatmul.msk.bf16.gmra.mxu2 %vm326_vm0, %v1113_v24 }
  0x4f   : > { %1054 = vmatmul.msk.bf16.gmra.mxu1 %vm326_vm0, %v1111_v23  ;;  %1056 = vmatmul.msk.bf16.gmra.mxu3 %vm326_vm0, %v1113_v24 }
  0x94   : > { %v289_v30 = vpop.permute.xlu2 %288 }
  0x9c   : > { %v294_v44 = vpop.permute.xlu2 %293 }
  0xab   : > { %v269_v25 = vpop.permute.xlu0 %268  ;;  %v279_v40 = vpop.permute.xlu1 %278 }
  0xb3   : > { %v274_v35 = vpop.permute.xlu0 %273  ;;  %v284_v54 = vpop.permute.xlu1 %283 }
  0xbb   : > { %v348_v26 = vpop.f32.mrf.mxu0  ;;  %v299_v56 = vpop.permute.xlu0 %298 }
  0xbc   : > { %v349_v27 = vadd.f32 %v348_v26, %v269_v25  ;;  %v377_v28 = vpop.f32.mrf.mxu1  ;;  %v304_v3 = vpop.permute.xlu1 %303 }
  0xbd   : > { %v378_v29 = vadd.f32 %v377_v28, %v269_v25 }
  0xbf   : > { %v397_v31 = vpack.c.bf16 %v378_v29, %v349_v27 }
  0xc1   : > { %405 = vst [vmem:[#allocation2] sm:$0xff] %v397_v31  ;;  %v358_v32 = vpop.f32.mrf.mxu2 }
  0xc2   : > { %v359_v33 = vadd.f32 %v358_v32, %v289_v30  ;;  %v387_v34 = vpop.f32.mrf.mxu3 }
  0xc3   : > { %v388_v36 = vadd.f32 %v387_v34, %v289_v30  ;;  %v350_v37 = vpop.f32.mrf.mxu0 }
  0xc4   : > { %v351_v38 = vadd.f32 %v350_v37, %v274_v35  ;;  %v379_v39 = vpop.f32.mrf.mxu1 }
  0xc5   : > { %v401_v41 = vpack.c.bf16 %v388_v36, %v359_v33  ;;  %v380_v42 = vadd.f32 %v379_v39, %v274_v35 }
  0xc7   : > { %409 = vst [vmem:[#allocation2 + $0x20] sm:$0xff] %v401_v41  ;;  %v398_v43 = vpack.c.bf16 %v380_v42, %v351_v38 }
  0xc9   : > { %406 = vst [vmem:[#allocation2 + $0x8] sm:$0xff] %v398_v43  ;;  %v360_v45 = vpop.f32.mrf.mxu2 }
  0xca   : > { %v361_v46 = vadd.f32 %v360_v45, %v294_v44  ;;  %v389_v47 = vpop.f32.mrf.mxu3 }
  0xcb   : > { %v390_v48 = vadd.f32 %v389_v47, %v294_v44  ;;  %v353_v49 = vpop.f32.mrf.mxu0 }
  0xcc   : > { %v354_v50 = vadd.f32 %v353_v49, %v279_v40  ;;  %v382_v51 = vpop.f32.mrf.mxu1 }
  0xcd   : > { %v402_v52 = vpack.c.bf16 %v390_v48, %v361_v46  ;;  %v383_v53 = vadd.f32 %v382_v51, %v279_v40 }
  0xcf   : > { %410 = vst [vmem:[#allocation2 + $0x28] sm:$0xff] %v402_v52  ;;  %v399_v55 = vpack.c.bf16 %v383_v53, %v354_v50 }
  0xd1   : > { %407 = vst [vmem:[#allocation2 + $0x10] sm:$0xff] %v399_v55  ;;  %v363_v57 = vpop.f32.mrf.mxu2 }
  0xd2   : > { %v364_v58 = vadd.f32 %v363_v57, %v299_v56  ;;  %v392_v59 = vpop.f32.mrf.mxu3 }
  0xd3   : > { %v393_v60 = vadd.f32 %v392_v59, %v299_v56  ;;  %v355_v61 = vpop.f32.mrf.mxu0 }
  0xd4   : > { %v356_v62 = vadd.f32 %v355_v61, %v284_v54  ;;  %v384_v63 = vpop.f32.mrf.mxu1 }
  0xd5   : > { %v403_v0 = vpack.c.bf16 %v393_v60, %v364_v58  ;;  %v385_v1 = vadd.f32 %v384_v63, %v284_v54 }
  0xd7   : > { %411 = vst [vmem:[#allocation2 + $0x30] sm:$0xff] %v403_v0  ;;  %v400_v2 = vpack.c.bf16 %v385_v1, %v356_v62 }
  0xd9   : > { %408 = vst [vmem:[#allocation2 + $0x18] sm:$0xff] %v400_v2  ;;  %v365_v4 = vpop.f32.mrf.mxu2 }
  0xda   : > { %v366_v5 = vadd.f32 %v365_v4, %v304_v3  ;;  %v394_v6 = vpop.f32.mrf.mxu3 }
  0xdb   : > { %v395_v7 = vadd.f32 %v394_v6, %v304_v3 }
  0xdd   : > { %v404_v8 = vpack.c.bf16 %v395_v7, %v366_v5 }
  0xdf   : > { %412 = vst [vmem:[#allocation2 + $0x38] sm:$0xff] %v404_v8 }
  0xe0 PF: > { %s1057_s25 = sshll.u32 %s1469_s23, 7  ;;  %v1065_v9 = vld [vmem:[#allocation2 + $0x10] sm:$0xf]  ;;  %v1116_v10 = vld [vmem:[#allocation2 + $0x14] sm:$0xf0]  ;;  %vm458_vm1 = vcmask 130048  }
  0xe1   : > { %s1695_s30 = sshra.s32 %s1057_s25, 7  ;;  %v1066_v11 = vor.u32 %v1116_v10, %v1065_v9  ;;  %v1115_v12 = vld [vmem:[#allocation2 + $0x14] sm:$0xf]  ;;  %v1067_v13 = vld [vmem:[#allocation2 + $0x18] sm:$0xf0]  ;;  %s901_s10 = sld [smem:[#allocation3]] }
  0xe2   : > { %s1058_s9 = sshll.u32 %s1695_s30, 2  ;;  %v1070_v14 = vor.u32 %v1115_v12, %v1067_v13  ;;  %s1103_s11 = sshll.u32 %s1695_s30, 3 }
  0xe3   : > { %490 = vmatpush.bf16.msra.mxu0 %v1066_v11  ;;  %s417_s16 = scalar_lea.vmem [#allocation2], %s1058_s9  ;;  %s1948_s5 = scalar_lea.vmem %s1630_s20, %s1103_s11 [#allocation4] }
  0xe4   : > { %539 = vmatpush.bf16.msra.mxu1 %v1070_v14  ;;  %s1105_s20 = sshll.u32 %s1473_s24, 3  ;;  %s929_s24 = sshll.u32 %s1639_s29, 4  ;;  %s930_s24 = int_to_ptr.vmem [resolvable:$true] %s929_s24 }
  0xe5   : > { %s926_s28 = sadd.s32 %s1469_s23, %s1105_s20  ;;  %s916_s23 = scalar_lea.sflag [#allocation6], %s230_s6 }
  0xe6   : > { %v1061_v15 = vld [vmem:[%s417_s16] sm:$0xf]  ;;  %v1114_v16 = vld [vmem:[%s417_s16 + $0x4] sm:$0xf0]  ;;  %s1106_s8 = sshll.u32 %s926_s28, 3  ;;  %s1383_s11 = scalar_lea.hbm %s2017_s4, 128 }
  0xe7   : > { %v1062_v17 = vor.u32 %v1114_v16, %v1061_v15  ;;  %s928_s3 = scalar_lea.hbm %s2017_s4, %s1106_s8 }
  0xe8   : > { %s931_s25 = sshll.u32 %s928_s3, 4  ;;  %s932_s25 = int_to_ptr.hbm [resolvable:$true] %s931_s25 }
  0xe9   : > { %432 = vxpose.xlu0.c.b16.start.end [1/1] (short) %v1062_v17, 128  ;;  %s1377_s30 = sshra.s32 %s932_s25, 4  ;;  %s1378_s30 = int_to_ptr.hbm [resolvable:$true] %s1377_s30 }
  0xea   : > { %s1379_s9 = scalar_lea.hbm %s1378_s30, 32  ;;  %p1384_p11 = scmp.lt.s32.totalorder %s1378_s30, %s2017_s4 }
  0xeb   : > { %p1380_p7 = scmp.ne.s32.totalorder %s1378_s30, %s1379_s9  ;;  %p1385_p13 = scmp.lt.s32.totalorder %s1383_s11, %s1379_s9 }
  0xed   : > { %p1381_p9 = pnand %p1380_p7, %p1603_p12  ;;  %p1386_p0 = por %p1385_p13, %p1384_p11 }
  0xef   : > { %p1382_p10 = pneg %p1381_p9 }
  0xf1   : > { %p1387_p1 = pnand %p1386_p0, %p1382_p10 }
 0x195   : > { %v440_v18 = vpop.trf.xlu0 }
 0x196   : > { %1071 = vmatmul.msk.bf16.vlgmr.msra.gmra.mxu0 %vm458_vm1, %v440_v18  ;;  %1079 = vmatmul.msk.bf16.vlgmr.msra.gmra.mxu1 %vm458_vm1, %v440_v18 }
 0x1a5   : > { %v441_v19 = vpop.trf.xlu0 }
 0x1a6   : > { %1072 = vmatmul.msk.bf16.gmra.mxu0 %vm458_vm1, %v441_v19  ;;  %1080 = vmatmul.msk.bf16.gmra.mxu1 %vm458_vm1, %v441_v19 }
 0x1b5   : > { %v442_v20 = vpop.trf.xlu0 }
 0x1b6   : > { %1073 = vmatmul.msk.bf16.gmra.mxu0 %vm458_vm1, %v442_v20  ;;  %1081 = vmatmul.msk.bf16.gmra.mxu1 %vm458_vm1, %v442_v20 }
 0x1c5   : > { %v443_v21 = vpop.trf.xlu0 }
 0x1c6   : > { %1074 = vmatmul.msk.bf16.gmra.mxu0 %vm458_vm1, %v443_v21  ;;  %1082 = vmatmul.msk.bf16.gmra.mxu1 %vm458_vm1, %v443_v21 }
 0x1d5   : > { %v444_v22 = vpop.trf.xlu0 }
 0x1d6   : > { %1075 = vmatmul.msk.bf16.gmra.mxu0 %vm458_vm1, %v444_v22  ;;  %1083 = vmatmul.msk.bf16.gmra.mxu1 %vm458_vm1, %v444_v22 }
 0x1e5   : > { %v445_v23 = vpop.trf.xlu0 }
 0x1e6   : > { %1076 = vmatmul.msk.bf16.gmra.mxu0 %vm458_vm1, %v445_v23  ;;  %1084 = vmatmul.msk.bf16.gmra.mxu1 %vm458_vm1, %v445_v23 }
 0x1f5   : > { %v446_v24 = vpop.trf.xlu0 }
 0x1f6   : > { %1077 = vmatmul.msk.bf16.gmra.mxu0 %vm458_vm1, %v446_v24  ;;  %1085 = vmatmul.msk.bf16.gmra.mxu1 %vm458_vm1, %v446_v24 }
 0x205   : > { %v447_v25 = vpop.trf.xlu0 }
 0x206   : > { %1078 = vmatmul.msk.bf16.gmra.mxu0 %vm458_vm1, %v447_v25  ;;  %1086 = vmatmul.msk.bf16.gmra.mxu1 %vm458_vm1, %v447_v25 }
 0x213   : > { %v1714_v26 = vpop.f32.mrf.mxu0  ;;  %v1716_v27 = vpop.f32.mrf.mxu1 }
 0x214   : > { %v581_v6 = vmax.f32 %v1714_v26, %v1716_v27 }
 0x21b   : > { %v1718_v28 = vpop.f32.mrf.mxu0  ;;  %v1720_v29 = vpop.f32.mrf.mxu1 }
 0x21c   : > { %v584_v9 = vmax.f32 %v1718_v28, %v1720_v29 }
 0x223   : > { %v1722_v30 = vpop.f32.mrf.mxu0  ;;  %v1724_v31 = vpop.f32.mrf.mxu1 }
 0x224   : > { %v587_v4 = vmax.f32 %v1722_v30, %v1724_v31 }
 0x22b   : > { %v1726_v32 = vpop.f32.mrf.mxu0  ;;  %v1728_v33 = vpop.f32.mrf.mxu1 }
 0x22c   : > { %v590_v8 = vmax.f32 %v1726_v32, %v1728_v33 }
 0x233   : > { %v1730_v34 = vpop.f32.mrf.mxu0  ;;  %v1732_v35 = vpop.f32.mrf.mxu1 }
 0x234   : > { %v593_v2 = vmax.f32 %v1730_v34, %v1732_v35 }
 0x23b   : > { %v1734_v36 = vpop.f32.mrf.mxu0  ;;  %v1736_v37 = vpop.f32.mrf.mxu1 }
 0x23c   : > { %v596_v7 = vmax.f32 %v1734_v36, %v1736_v37 }
 0x243   : > { %v1738_v38 = vpop.f32.mrf.mxu0  ;;  %v1740_v39 = vpop.f32.mrf.mxu1 }
 0x244   : > { %v599_v0 = vmax.f32 %v1738_v38, %v1740_v39 }
 0x24b   : > { %v1742_v40 = vpop.f32.mrf.mxu0  ;;  %v1744_v41 = vpop.f32.mrf.mxu1 }
 0x24c   : > { %v602_v5 = vmax.f32 %v1742_v40, %v1744_v41 }
 0x253   : > { %v1746_v42 = vpop.f32.mrf.mxu0  ;;  %v1748_v43 = vpop.f32.mrf.mxu1 }
 0x254   : > { %v605_v63 = vmax.f32 %v1746_v42, %v1748_v43 }
 0x25b   : > { %v1750_v44 = vpop.f32.mrf.mxu0  ;;  %v1752_v45 = vpop.f32.mrf.mxu1 }
 0x25c   : > { %v608_v3 = vmax.f32 %v1750_v44, %v1752_v45 }
 0x263   : > { %v1754_v46 = vpop.f32.mrf.mxu0  ;;  %v1756_v47 = vpop.f32.mrf.mxu1 }
 0x264   : > { %v611_v58 = vmax.f32 %v1754_v46, %v1756_v47 }
 0x26b   : > { %v1758_v48 = vpop.f32.mrf.mxu0  ;;  %v1760_v49 = vpop.f32.mrf.mxu1 }
 0x26c   : > { %v614_v1 = vmax.f32 %v1758_v48, %v1760_v49 }
 0x273   : > { %v522_v50 = vpop.f32.mrf.mxu0  ;;  %v571_v51 = vpop.f32.mrf.mxu1 }
 0x274   : > { %v617_v52 = vmax.f32 %v522_v50, %v571_v51 }
 0x276   : > { %618 = vmax.xlane.f32.xlu1 %v617_v52 }
 0x27b   : > { %v1762_v53 = vpop.f32.mrf.mxu0  ;;  %v1764_v54 = vpop.f32.mrf.mxu1 }
 0x27c   : > { %v620_v55 = vmax.f32 %v1762_v53, %v1764_v54 }
 0x27e   : > { %621 = vmax.xlane.f32.xlu2 %v620_v55 }
 0x283   : > { %v527_v56 = vpop.f32.mrf.mxu0  ;;  %v576_v57 = vpop.f32.mrf.mxu1 }
 0x284   : > { %v623_v59 = vmax.f32 %v527_v56, %v576_v57 }
 0x286   : > { %612 = vmax.xlane.f32.xlu2 %v611_v58  ;;  %624 = vmax.xlane.f32.xlu0 %v623_v59 }
 0x28b   : > { %v529_v60 = vpop.f32.mrf.mxu0  ;;  %v578_v61 = vpop.f32.mrf.mxu1 }
 0x28c   : > { %v626_v62 = vmax.f32 %v529_v60, %v578_v61 }
 0x28e   : > { %606 = vmax.xlane.f32.xlu2 %v605_v63  ;;  %627 = vmax.xlane.f32.xlu1 %v626_v62 }
 0x296   : > { %600 = vmax.xlane.f32.xlu2 %v599_v0  ;;  %615 = vmax.xlane.f32.xlu1 %v614_v1 }
 0x29e   : > { %594 = vmax.xlane.f32.xlu2 %v593_v2  ;;  %609 = vmax.xlane.f32.xlu1 %v608_v3 }
 0x2a6   : > { %588 = vmax.xlane.f32.xlu2 %v587_v4  ;;  %603 = vmax.xlane.f32.xlu1 %v602_v5 }
 0x2ae   : > { %582 = vmax.xlane.f32.xlu2 %v581_v6  ;;  %597 = vmax.xlane.f32.xlu1 %v596_v7 }
 0x2b6   : > { %591 = vmax.xlane.f32.xlu1 %v590_v8 }
 0x2be   : > { %585 = vmax.xlane.f32.xlu1 %v584_v9 }
 0x2e9   : > { %v619_v11 = vpop.xlane.xlu1 %618 }
 0x2ea   : > { %v653_v18 = vsub.f32 %v522_v50, %v619_v11  ;;  %v654_v19 = vsub.f32 %v571_v51, %v619_v11 }
 0x2ec   : > { %v709_v22 = vmul.f32 1.442695, %v653_v18  ;;  %v711_v25 = vmul.f32 1.442695, %v654_v19 }
 0x2f1   : > { %v622_v10 = vpop.xlane.xlu2 %621 }
 0x2f2   : > { %v655_v52 = vsub.f32 %v1762_v53, %v622_v10  ;;  %v656_v58 = vsub.f32 %v1764_v54, %v622_v10 }
 0x2f4   : > { %v713_v62 = vmul.f32 1.442695, %v655_v52  ;;  %v715_v53 = vmul.f32 1.442695, %v656_v58 }
 0x2f9   : > { %v613_v12 = vpop.xlane.xlu2 %612  ;;  %v625_v13 = vpop.xlane.xlu0 %624 }
 0x2fa   : > { %v657_v14 = vsub.f32 %v527_v56, %v625_v13  ;;  %v658_v15 = vsub.f32 %v576_v57, %v625_v13  ;;  %v649_v50 = vsub.f32 %v1754_v46, %v613_v12  ;;  %v650_v57 = vsub.f32 %v1756_v47, %v613_v12 }
 0x2fc   : > { %v717_v16 = vmul.f32 1.442695, %v657_v14  ;;  %v719_v17 = vmul.f32 1.442695, %v658_v15  ;;  %v701_v54 = vmul.f32 1.442695, %v649_v50 }
 0x2fd   : > { %v703_v63 = vmul.f32 1.442695, %v650_v57 }
 0x2fe   : > { %1237 = vpow2.f32 %v717_v16 }
 0x2ff   : > { %1239 = vpow2.f32 %v719_v17 }
 0x300   : > { %1241 = vpow2.f32 %v709_v22 }
 0x301   : > { %v607_v20 = vpop.xlane.xlu2 %606  ;;  %v628_v21 = vpop.xlane.xlu1 %627  ;;  %1243 = vpow2.f32 %v711_v25 }
 0x302   : > { %v659_v23 = vsub.f32 %v529_v60, %v628_v21  ;;  %v660_v24 = vsub.f32 %v578_v61, %v628_v21  ;;  %v645_v46 = vsub.f32 %v1746_v42, %v607_v20  ;;  %v646_v47 = vsub.f32 %v1748_v43, %v607_v20 }
 0x304   : > { %v721_v55 = vmul.f32 1.442695, %v659_v23  ;;  %v723_v59 = vmul.f32 1.442695, %v660_v24  ;;  %v1794_v56 = vpop.eup %1237  ;;  %v693_v7 = vmul.f32 1.442695, %v645_v46 }
 0x305   : > { %v1797_v51 = vpop.eup %1239  ;;  %v695_v9 = vmul.f32 1.442695, %v646_v47 }
 0x306   : > { %1245 = vpow2.f32 %v721_v55  ;;  %v767_v60 = vadd.f32 %v1797_v51, %v1794_v56  ;;  %v1802_v1 = vpop.eup %1241 }
 0x307   : > { %1247 = vpow2.f32 %v723_v59  ;;  %v1805_v2 = vpop.eup %1243 }
 0x308   : > { %768 = vadd.xlane.f32.xlu2 %v767_v60  ;;  %1249 = vpow2.f32 %v713_v62  ;;  %v761_v8 = vadd.f32 %v1805_v2, %v1802_v1 }
 0x309   : > { %v616_v61 = vpop.xlane.xlu1 %615  ;;  %v601_v0 = vpop.xlane.xlu2 %600  ;;  %1251 = vpow2.f32 %v715_v53 }
 0x30a   : > { %1253 = vpow2.f32 %v701_v54  ;;  %v651_v4 = vsub.f32 %v1758_v48, %v616_v61  ;;  %v652_v6 = vsub.f32 %v1760_v49, %v616_v61  ;;  %v641_v49 = vsub.f32 %v1738_v38, %v601_v0 }
 0x30b   : > { %1255 = vpow2.f32 %v703_v63  ;;  %v642_v15 = vsub.f32 %v1740_v39, %v601_v0 }
 0x30c   : > { %v1808_v3 = vpop.eup %1245  ;;  %v705_v11 = vmul.f32 1.442695, %v651_v4  ;;  %v707_v12 = vmul.f32 1.442695, %v652_v6  ;;  %1257 = vpow2.f32 %v693_v7  ;;  %v685_v19 = vmul.f32 1.442695, %v641_v49 }
 0x30d   : > { %v1811_v5 = vpop.eup %1247  ;;  %1259 = vpow2.f32 %v695_v9  ;;  %v687_v38 = vmul.f32 1.442695, %v642_v15 }
 0x30e   : > { %v770_v42 = vadd.f32 %v1811_v5, %v1808_v3  ;;  %v1818_v43 = vpop.eup %1249  ;;  %1261 = vpow2.f32 %v705_v11 }
 0x30f   : > { %v1820_v48 = vpop.eup %1251  ;;  %1263 = vpow2.f32 %v707_v12 }
 0x310   : > { %762 = vadd.xlane.f32.xlu2 %v761_v8  ;;  %771 = vadd.xlane.f32.xlu1 %v770_v42  ;;  %v1822_v13 = vpop.eup %1253  ;;  %v764_v21 = vadd.f32 %v1820_v48, %v1818_v43  ;;  %1265 = vpow2.f32 %v685_v19 }
 0x311   : > { %v610_v10 = vpop.xlane.xlu1 %609  ;;  %v1825_v14 = vpop.eup %1255  ;;  %1267 = vpow2.f32 %v687_v38 }
 0x312   : > { %v595_v16 = vpop.xlane.xlu2 %594  ;;  %v647_v17 = vsub.f32 %v1750_v44, %v610_v10  ;;  %v648_v18 = vsub.f32 %v1752_v45, %v610_v10  ;;  %v755_v20 = vadd.f32 %v1825_v14, %v1822_v13  ;;  %v1834_v23 = vpop.eup %1257 }
 0x313   : > { %v1836_v39 = vpop.eup %1259  ;;  %v637_v45 = vsub.f32 %v1730_v34, %v595_v16  ;;  %v638_v55 = vsub.f32 %v1732_v35, %v595_v16 }
 0x314   : > { %v697_v24 = vmul.f32 1.442695, %v647_v17  ;;  %v699_v44 = vmul.f32 1.442695, %v648_v18  ;;  %v1838_v25 = vpop.eup %1261  ;;  %v749_v62 = vadd.f32 %v1836_v39, %v1834_v23 }
 0x315   : > { %v1841_v52 = vpop.eup %1263  ;;  %v677_v57 = vmul.f32 1.442695, %v637_v45  ;;  %v679_v34 = vmul.f32 1.442695, %v638_v55 }
 0x316   : > { %1269 = vpow2.f32 %v697_v24  ;;  %v758_v60 = vadd.f32 %v1841_v52, %v1838_v25  ;;  %v1850_v61 = vpop.eup %1265 }
 0x317   : > { %1271 = vpow2.f32 %v699_v44  ;;  %v1852_v35 = vpop.eup %1267 }
 0x318   : > { %756 = vadd.xlane.f32.xlu2 %v755_v20  ;;  %765 = vadd.xlane.f32.xlu1 %v764_v21  ;;  %1273 = vpow2.f32 %v677_v57  ;;  %v743_v7 = vadd.f32 %v1852_v35, %v1850_v61 }
 0x319   : > { %v604_v22 = vpop.xlane.xlu1 %603  ;;  %1275 = vpow2.f32 %v679_v34 }
 0x31a   : > { %v643_v58 = vsub.f32 %v1742_v40, %v604_v22  ;;  %v589_v59 = vpop.xlane.xlu2 %588  ;;  %v644_v50 = vsub.f32 %v1744_v41, %v604_v22 }
 0x31b   : > { %v633_v41 = vsub.f32 %v1722_v30, %v589_v59  ;;  %v634_v46 = vsub.f32 %v1724_v31, %v589_v59 }
 0x31c   : > { %v689_v54 = vmul.f32 1.442695, %v643_v58  ;;  %v691_v40 = vmul.f32 1.442695, %v644_v50  ;;  %v1854_v63 = vpop.eup %1269 }
 0x31d   : > { %v1857_v0 = vpop.eup %1271  ;;  %v669_v6 = vmul.f32 1.442695, %v633_v41  ;;  %v671_v42 = vmul.f32 1.442695, %v634_v46 }
 0x31e   : > { %1277 = vpow2.f32 %v689_v54  ;;  %v752_v8 = vadd.f32 %v1857_v0, %v1854_v63  ;;  %v1866_v10 = vpop.eup %1273 }
 0x31f   : > { %1279 = vpow2.f32 %v691_v40  ;;  %v1868_v31 = vpop.eup %1275 }
 0x320   : > { %750 = vadd.xlane.f32.xlu2 %v749_v62  ;;  %759 = vadd.xlane.f32.xlu1 %v758_v60  ;;  %1281 = vpow2.f32 %v669_v6  ;;  %v737_v19 = vadd.f32 %v1868_v31, %v1866_v10 }
 0x321   : > { %v598_v53 = vpop.xlane.xlu1 %597  ;;  %1283 = vpow2.f32 %v671_v42 }
 0x322   : > { %v639_v47 = vsub.f32 %v1734_v36, %v598_v53  ;;  %v640_v4 = vsub.f32 %v1736_v37, %v598_v53  ;;  %v583_v30 = vpop.xlane.xlu2 %582 }
 0x323   : > { %v629_v37 = vsub.f32 %v1714_v26, %v583_v30  ;;  %v630_v15 = vsub.f32 %v1716_v27, %v583_v30 }
 0x324   : > { %v681_v11 = vmul.f32 1.442695, %v639_v47  ;;  %v683_v36 = vmul.f32 1.442695, %v640_v4  ;;  %v1870_v12 = vpop.eup %1277 }
 0x325   : > { %v1873_v49 = vpop.eup %1279  ;;  %v661_v18 = vmul.f32 1.442695, %v629_v37  ;;  %v663_v21 = vmul.f32 1.442695, %v630_v15 }
 0x326   : > { %1285 = vpow2.f32 %v681_v11  ;;  %v746_v20 = vadd.f32 %v1873_v49, %v1870_v12  ;;  %v1882_v26 = vpop.eup %1281 }
 0x327   : > { %1287 = vpow2.f32 %v683_v36  ;;  %v1884_v27 = vpop.eup %1283 }
 0x328   : > { %744 = vadd.xlane.f32.xlu2 %v743_v7  ;;  %753 = vadd.xlane.f32.xlu1 %v752_v8  ;;  %1289 = vpow2.f32 %v661_v18  ;;  %v731_v55 = vadd.f32 %v1884_v27, %v1882_v26 }
 0x329   : > { %v592_v9 = vpop.xlane.xlu1 %591  ;;  %1291 = vpow2.f32 %v663_v21 }
 0x32a   : > { %v635_v16 = vsub.f32 %v1726_v32, %v592_v9  ;;  %v636_v17 = vsub.f32 %v1728_v33, %v592_v9 }
 0x32c   : > { %v673_v38 = vmul.f32 1.442695, %v635_v16  ;;  %v675_v22 = vmul.f32 1.442695, %v636_v17  ;;  %v1886_v24 = vpop.eup %1285 }
 0x32d   : > { %v1888_v33 = vpop.eup %1287 }
 0x32e   : > { %1293 = vpow2.f32 %v673_v38  ;;  %v740_v58 = vadd.f32 %v1888_v33, %v1886_v24  ;;  %v1896_v59 = vpop.eup %1289 }
 0x32f   : > { %1295 = vpow2.f32 %v675_v22  ;;  %v1898_v57 = vpop.eup %1291 }
 0x330   : > { %738 = vadd.xlane.f32.xlu2 %v737_v19  ;;  %747 = vadd.xlane.f32.xlu1 %v746_v20 }
 0x331   : > { %v586_v32 = vpop.xlane.xlu1 %585 }
 0x332   : > { %v631_v44 = vsub.f32 %v1718_v28, %v586_v32  ;;  %v632_v45 = vsub.f32 %v1720_v29, %v586_v32  ;;  %v725_v29 = vadd.f32 %v1898_v57, %v1896_v59 }
 0x334   : > { %v665_v50 = vmul.f32 1.442695, %v631_v44  ;;  %v667_v62 = vmul.f32 1.442695, %v632_v45  ;;  %v1900_v60 = vpop.eup %1293 }
 0x335   : > { %v1902_v28 = vpop.eup %1295 }
 0x336   : > { %1297 = vpow2.f32 %v665_v50  ;;  %v734_v34 = vadd.f32 %v1902_v28, %v1900_v60 }
 0x337   : > { %1299 = vpow2.f32 %v667_v62 }
 0x338   : > { %732 = vadd.xlane.f32.xlu2 %v731_v55  ;;  %741 = vadd.xlane.f32.xlu1 %v740_v58 }
 0x33c   : > { %v1908_v53 = vpop.eup %1297 }
 0x33d   : > { %v1910_v54 = vpop.eup %1299 }
 0x33e   : > { %v728_v40 = vadd.f32 %v1910_v54, %v1908_v53 }
 0x340   : > { %726 = vadd.xlane.f32.xlu2 %v725_v29  ;;  %735 = vadd.xlane.f32.xlu1 %v734_v34 }
 0x348   : > { %729 = vadd.xlane.f32.xlu1 %v728_v40 }
 0x37b   : > { %v769_v41 = vpop.xlane.xlu2 %768 }
 0x37c   : > { %1301 = vrcp.f32 %v769_v41 }
 0x382   : > { %v1302_v4 = vpop.eup %1301 }
 0x383   : > { %v763_v46 = vpop.xlane.xlu2 %762  ;;  %v772_v47 = vpop.xlane.xlu1 %771  ;;  %v817_v42 = vmul.f32 %v1302_v4, %v1794_v56  ;;  %v818_v9 = vmul.f32 %v1302_v4, %v1797_v51 }
 0x384   : > { %1303 = vrcp.f32 %v772_v47 }
 0x385   : > { %1305 = vrcp.f32 %v763_v46 }
 0x38a   : > { %v1304_v6 = vpop.eup %1303 }
 0x38b   : > { %v757_v7 = vpop.xlane.xlu2 %756  ;;  %v766_v8 = vpop.xlane.xlu1 %765  ;;  %v819_v30 = vmul.f32 %v1304_v6, %v1808_v3  ;;  %v820_v11 = vmul.f32 %v1304_v6, %v1811_v5 }
 0x38c   : > { %1307 = vrcp.f32 %v766_v8  ;;  %v1306_v15 = vpop.eup %1305 }
 0x38d   : > { %v835_v36 = vpack.c.bf16 %v819_v30, %v817_v42  ;;  %v836_v37 = vpack.c.bf16 %v820_v11, %v818_v9  ;;  %1309 = vrcp.f32 %v757_v7  ;;  %v813_v19 = vmul.f32 %v1306_v15, %v1802_v1 }
 0x38e   : > { %v814_v3 = vmul.f32 %v1306_v15, %v1805_v2 }
 0x38f   : > { %857 = vmatpush.bf16.xpose.msra.mxu2 %v835_v36  ;;  %876 = vmatpush.bf16.xpose.msra.mxu3 %v836_v37 }
 0x392   : > { %v1308_v16 = vpop.eup %1307 }
 0x393   : > { %v751_v17 = vpop.xlane.xlu2 %750  ;;  %v760_v18 = vpop.xlane.xlu1 %759  ;;  %v815_v56 = vmul.f32 %v1308_v16, %v1818_v43  ;;  %v816_v51 = vmul.f32 %v1308_v16, %v1820_v48 }
 0x394   : > { %1311 = vrcp.f32 %v760_v18  ;;  %v1310_v21 = vpop.eup %1309 }
 0x395   : > { %v833_v5 = vpack.c.bf16 %v815_v56, %v813_v19  ;;  %v834_v20 = vpack.c.bf16 %v816_v51, %v814_v3  ;;  %1313 = vrcp.f32 %v751_v17  ;;  %v809_v44 = vmul.f32 %v1310_v21, %v1822_v13 }
 0x396   : > { %v810_v43 = vmul.f32 %v1310_v21, %v1825_v14  ;;  %v1091_v21 = vld [vmem:[#allocation2 + $0x28] sm:$0xf0] }
 0x397   : > { %858 = vmatpush.bf16.xpose.msra.mxu2 %v833_v5  ;;  %877 = vmatpush.bf16.xpose.msra.mxu3 %v834_v20  ;;  %v1089_v20 = vld [vmem:[#allocation2 + $0x20] sm:$0xf] }
 0x39a   : > { %v1312_v38 = vpop.eup %1311 }
 0x39b   : > { %v745_v22 = vpop.xlane.xlu2 %744  ;;  %v754_v32 = vpop.xlane.xlu1 %753  ;;  %v811_v1 = vmul.f32 %v1312_v38, %v1838_v25  ;;  %v812_v2 = vmul.f32 %v1312_v38, %v1841_v52 }
 0x39c   : > { %1315 = vrcp.f32 %v754_v32  ;;  %v1314_v55 = vpop.eup %1313  ;;  %v1119_v32 = vld [vmem:[#allocation2 + $0x34] sm:$0xf] }
 0x39d   : > { %v831_v48 = vpack.c.bf16 %v811_v1, %v809_v44  ;;  %v832_v45 = vpack.c.bf16 %v812_v2, %v810_v43  ;;  %1317 = vrcp.f32 %v745_v22  ;;  %v805_v29 = vmul.f32 %v1314_v55, %v1834_v23 }
 0x39e   : > { %v806_v25 = vmul.f32 %v1314_v55, %v1836_v39  ;;  %v902_v2 = vstv %s901_s10 }
 0x39f   : > { %859 = vmatpush.bf16.xpose.msra.mxu2 %v831_v48  ;;  %878 = vmatpush.bf16.xpose.msra.mxu3 %v832_v45  ;;  %v897_v45 = vld [vmem:[%s1948_s5] sm:$0xff] }
 0x3a2   : > { %v1316_v58 = vpop.eup %1315 }
 0x3a3   : > { %v739_v50 = vpop.xlane.xlu2 %738  ;;  %v748_v62 = vpop.xlane.xlu1 %747  ;;  %v807_v13 = vmul.f32 %v1316_v58, %v1854_v63  ;;  %v808_v14 = vmul.f32 %v1316_v58, %v1857_v0 }
 0x3a4   : > { %1319 = vrcp.f32 %v748_v62  ;;  %v1318_v40 = vpop.eup %1317 }
 0x3a5   : > { %v829_v52 = vpack.c.bf16 %v807_v13, %v805_v29  ;;  %v830_v34 = vpack.c.bf16 %v808_v14, %v806_v25  ;;  %1321 = vrcp.f32 %v739_v50  ;;  %v801_v47 = vmul.f32 %v1318_v40, %v1850_v61  ;;  %v898_v13 = vld [vmem:[%s1948_s5 + $0x10] sm:$0xff] }
 0x3a6   : > { %v802_v23 = vmul.f32 %v1318_v40, %v1852_v35 }
 0x3a7   : > { %860 = vmatpush.bf16.xpose.msra.mxu2 %v829_v52  ;;  %879 = vmatpush.bf16.xpose.msra.mxu3 %v830_v34 }
 0x3aa   : > { %v1320_v41 = vpop.eup %1319 }
 0x3ab   : > { %v742_v46 = vpop.xlane.xlu1 %741  ;;  %v803_v4 = vmul.f32 %v1320_v41, %v1870_v12  ;;  %v804_v63 = vmul.f32 %v1320_v41, %v1873_v49  ;;  %v733_v39 = vpop.xlane.xlu2 %732  ;;  %v899_v41 = vld [vmem:[%s1948_s5 + $0x20] sm:$0xff] }
 0x3ac   : > { %1323 = vrcp.f32 %v742_v46  ;;  %v1322_v7 = vpop.eup %1321 }
 0x3ad   : > { %v827_v0 = vpack.c.bf16 %v803_v4, %v801_v47  ;;  %v828_v6 = vpack.c.bf16 %v804_v63, %v802_v23  ;;  %1325 = vrcp.f32 %v733_v39  ;;  %v797_v30 = vmul.f32 %v1322_v7, %v1866_v10  ;;  %v900_v39 = vld [vmem:[%s1948_s5 + $0x30] sm:$0xff] }
 0x3ae   : > { %v798_v12 = vmul.f32 %v1322_v7, %v1868_v31 }
 0x3af   : > { %861 = vmatpush.bf16.xpose.msra.mxu2 %v827_v0  ;;  %880 = vmatpush.bf16.xpose.msra.mxu3 %v828_v6 }
 0x3b2   : > { %v1324_v8 = vpop.eup %1323 }
 0x3b3   : > { %v736_v42 = vpop.xlane.xlu1 %735  ;;  %v799_v61 = vmul.f32 %v1324_v8, %v1886_v24  ;;  %v800_v35 = vmul.f32 %v1324_v8, %v1888_v33  ;;  %v727_v11 = vpop.xlane.xlu2 %726 }
 0x3b4   : > { %1327 = vrcp.f32 %v736_v42  ;;  %v1326_v36 = vpop.eup %1325 }
 0x3b5   : > { %v825_v49 = vpack.c.bf16 %v799_v61, %v797_v30  ;;  %v826_v9 = vpack.c.bf16 %v800_v35, %v798_v12  ;;  %1329 = vrcp.f32 %v727_v11  ;;  %v793_v16 = vmul.f32 %v1326_v36, %v1882_v26 }
 0x3b6   : > { %v794_v24 = vmul.f32 %v1326_v36, %v1884_v27  ;;  %v1118_v27 = vld [vmem:[#allocation2 + $0x24] sm:$0xf0] }
 0x3b7   : > { %862 = vmatpush.bf16.xpose.msra.mxu2 %v825_v49  ;;  %881 = vmatpush.bf16.xpose.msra.mxu3 %v826_v9  ;;  %v1090_v38 = vor.u32 %v1118_v27, %v1089_v20 }
 0x3ba   : > { %v1328_v37 = vpop.eup %1327 }
 0x3bb   : > { %v730_v15 = vpop.xlane.xlu1 %729  ;;  %v795_v10 = vmul.f32 %v1328_v37, %v1900_v60  ;;  %v796_v31 = vmul.f32 %v1328_v37, %v1902_v28  ;;  %v1330_v18 = vpop.eup %1329  ;;  %v1117_v28 = vld [vmem:[#allocation2 + $0x24] sm:$0xf] }
 0x3bc   : > { %1331 = vrcp.f32 %v730_v15  ;;  %v789_v56 = vmul.f32 %v1330_v18, %v1896_v59  ;;  %v790_v51 = vmul.f32 %v1330_v18, %v1898_v57  ;;  %v1094_v22 = vor.u32 %v1117_v28, %v1091_v21  ;;  %v1097_v59 = vld [vmem:[#allocation2 + $0x30] sm:$0xf]  ;;  %v1099_v57 = vld [vmem:[#allocation2 + $0x38] sm:$0xf0] }
 0x3bd   : > { %v823_v33 = vpack.c.bf16 %v795_v10, %v793_v16  ;;  %v824_v17 = vpack.c.bf16 %v796_v31, %v794_v24  ;;  %v1102_v44 = vor.u32 %v1119_v32, %v1099_v57 }
 0x3bf   : > { %863 = vmatpush.bf16.xpose.msra.mxu2 %v823_v33  ;;  %882 = vmatpush.bf16.xpose.msra.mxu3 %v824_v17 }
 0x3c2   : > { %v1332_v19 = vpop.eup %1331 }
 0x3c3   : > { %v791_v3 = vmul.f32 %v1332_v19, %v1908_v53  ;;  %v792_v26 = vmul.f32 %v1332_v19, %v1910_v54  ;;  %v1120_v53 = vld [vmem:[#allocation2 + $0x34] sm:$0xf0] }
 0x3c4   : > { %v1098_v54 = vor.u32 %v1120_v53, %v1097_v59 }
 0x3c5   : > { %v821_v5 = vpack.c.bf16 %v791_v3, %v789_v56  ;;  %v822_v60 = vpack.c.bf16 %v792_v26, %v790_v51 }
 0x3c7   : > { %864 = vmatpush.bf16.xpose.msra.mxu2 %v821_v5  ;;  %883 = vmatpush.bf16.xpose.msra.mxu3 %v822_v60 }
 0x3ce   : > { %865 = vmatmul.bf16.vlgmr.msra.gmra.mxu2 %v1090_v38  ;;  %884 = vmatmul.bf16.vlgmr.msra.gmra.mxu3 %v1094_v22 }
 0x3de   : > { %870 = vmatmul.bf16.gmra.mxu2 %v1098_v54  ;;  %889 = vmatmul.bf16.gmra.mxu3 %v1102_v44 }
 0x451   : > { %v866_v1 = vpop.f32.mrf.mxu2  ;;  %v885_v43 = vpop.f32.mrf.mxu3 }
 0x452   : > { %v886_v48 = vadd.f32 %v885_v43, %v866_v1 }
 0x454   : > { %v903_v55 = vmul.f32 %v902_v2, %v886_v48 }
 0x456   : > { %v907_v58 = vadd.f32 %v903_v55, %v897_v45 }
 0x458   : > { %911 = vst [vmem:[%s1639_s29] sm:$0xff] %v907_v58 }
 0x459   : > { %v868_v50 = vpop.f32.mrf.mxu2  ;;  %v887_v62 = vpop.f32.mrf.mxu3 }
 0x45a   : > { %v888_v29 = vadd.f32 %v887_v62, %v868_v50 }
 0x45c   : > { %v904_v25 = vmul.f32 %v902_v2, %v888_v29 }
 0x45e   : > { %v908_v14 = vadd.f32 %v904_v25, %v898_v13 }
 0x460   : > { %912 = vst [vmem:[%s1639_s29 + $0x8] sm:$0xff] %v908_v14 }
 0x461   : > { %v871_v52 = vpop.f32.mrf.mxu2  ;;  %v890_v34 = vpop.f32.mrf.mxu3 }
 0x462   : > { %v891_v40 = vadd.f32 %v890_v34, %v871_v52 }
 0x464   : > { %v905_v46 = vmul.f32 %v902_v2, %v891_v40 }
 0x466   : > { %v909_v47 = vadd.f32 %v905_v46, %v899_v41 }
 0x468   : > { %913 = vst [vmem:[%s1639_s29 + $0x10] sm:$0xff] %v909_v47 }
 0x469   : > { %v873_v4 = vpop.f32.mrf.mxu2  ;;  %v892_v23 = vpop.f32.mrf.mxu3 }
 0x46a   : > { %v893_v63 = vadd.f32 %v892_v23, %v873_v4 }
 0x46c   : > { %v906_v0 = vmul.f32 %v902_v2, %v893_v63 }
 0x46e   : > { %v910_v6 = vadd.f32 %v906_v0, %v900_v39 }
 0x470   : > { %914 = vst [vmem:[%s1639_s29 + $0x18] sm:$0xff] %v910_v6 }
 0x471   : > { %1390 = shalt.err (!%p1387_p1)
}
 0x472   : > { %s1490_s6 = smov 128   ;;  %s1491_s29 = smov 256  }
 0x473   : > { %s1492_s28 = smov 8  }
 0x474   : > { %1127 = dma.vmem_to_hbm [thread:$0]  (%p1603_p12), %s930_s24, 512, %s932_s25, %s916_s23, %s1490_s6, %s1491_s29, %s1492_s28  }
 0x475 PF: > { %p1138_p4 = scmp.ge.s32.totalorder %s1485_s26, 2  ;;  %s946_s8 = sand.u32 1, %s1445_s17  }
 0x476   : > { %s947_s7 = scalar_lea.sflag [#allocation6], %s946_s8 }
 0x477   : > { %p1134_p5 = pnand %p1138_p4, %p1616_p2 }
 0x479   : > { %p1135_p6 = pneg %p1134_p5 }
 0x47b   : > { %1440 = dma.done.wait (%p1135_p6), %s947_s7, 512  }
 0x47c   : > { %1442 = vsyncadd (%p1135_p6), %s947_s7, 4294966784  ;;  %s21_s26 = sadd.s32 1, %s1485_s26   ;;  %s2030_s23 = sld [smem:[#allocation10_spill]] }
 0x47d   : > { %p18_p8 = scmp.ge.s32.totalorder %s21_s26, 6   ;;  %s2031_s24 = sld [smem:[#allocation11_spill]] }
 0x47e   : > { %s2032_s3 = sld [smem:[#allocation12_spill]]  ;;  %s2034_s17 = smov %s1449_s18 }
 0x47f   : > { %s2033_s25 = sld [smem:[#allocation13_spill]]  ;;  %s2035_s18 = smov %s1453_s19 }
 0x480   : > { %s2036_s19 = smov %s1611_s14  ;;  %s2037_s20 = smov %s1461_s21 }
 0x481   : > { %s2038_s21 = smov %s1465_s22  ;;  %s2039_s22 = smov %s1608_s13 }
 0x482   :  { %20 = sbr.rel (!%p18_p8) target bundleno = 11 (0xb), region = 87 }
 0x487   :  { %953 = vsyncpa [#allocation5], 1 }
 0x488   :  { %955 = vsyncpa [#allocation5 + $0x1], 1 }
 0x489   :  { %956 = vsyncpa [#allocation6], 1 }
 0x48a   :  { %958 = vsyncpa [#allocation6 + $0x1], 1 }

</bundles_post_ra>
